<compile_context>
chip_gen: v7x
topology: tpu7x:2x2x1
jax: 0.10.0
libtpu: 0.0.40
codegen_flags: <defaults>
</compile_context>

<pallas_src>
import functools

import jax
import jax.numpy as jnp
import numpy as np
from jax.experimental import pallas as pl
from jax.experimental.pallas import tpu as pltpu


def _round_up(x, m):
    return (x + m - 1) // m * m


# ----------------------------------------------------------------------------
# Kernel
# ----------------------------------------------------------------------------
def gru_cell_kernel(xh_ref, h_ref, w_ref, b_ref, out_ref):
    # xh: (TB, Kp) bf16   h: (TB, Hp) f32   w: (Kp, 4*Hp) bf16   b: (1, 4*Hp) f32
    z = jnp.dot(xh_ref[...], w_ref[...], preferred_element_type=jnp.float32)
    z = z + b_ref[...]

    Hp = out_ref.shape[1]
    r = jax.nn.sigmoid(z[:, 0 * Hp:1 * Hp])      # reset gate   (lane-aligned slice)
    u = jax.nn.sigmoid(z[:, 1 * Hp:2 * Hp])      # update gate
    xc = z[:, 2 * Hp:3 * Hp]                     # candidate, x pre-activation
    hc = z[:, 3 * Hp:4 * Hp]                     # candidate, h pre-activation

    cand = jnp.tanh(xc + r * hc)
    h = h_ref[...]
    # u*h + (1-u)*c  ==  c + u*(h - c)   (one fewer VPU multiply)
    out_ref[...] = (cand + u * (h - cand)).astype(out_ref.dtype)


# ----------------------------------------------------------------------------
# Parameter packing (do once, reuse every step)
# ----------------------------------------------------------------------------
def pack_gru_params(wx, bx, wh, bh, input_size, hidden_size):
    """Pack PyTorch-style GRUCell params into the fused (Kp, 4*Hp) layout.

    wx: (I, 3H), bx: (3H,), wh: (H, 3H), bh: (3H,) — gate order along the 3H
    axis matches torch .chunk(3, 1): [reset | update | candidate].
    (wx/wh are the transposes of nn.Linear .weight.)
    """
    I, H = input_size, hidden_size
    Hp = _round_up(H, 128)
    Kp = _round_up(I + H, 128)
    f32, bf16 = jnp.float32, jnp.bfloat16

    w = jnp.zeros((Kp, 4 * Hp), f32)
    w = w.at[:I,      0 * Hp:0 * Hp + H].set(wx[:, 0 * H:1 * H])   # reset (x)
    w = w.at[I:I + H, 0 * Hp:0 * Hp + H].set(wh[:, 0 * H:1 * H])   # reset (h)
    w = w.at[:I,      1 * Hp:1 * Hp + H].set(wx[:, 1 * H:2 * H])   # update (x)
    w = w.at[I:I + H, 1 * Hp:1 * Hp + H].set(wh[:, 1 * H:2 * H])   # update (h)
    w = w.at[:I,      2 * Hp:2 * Hp + H].set(wx[:, 2 * H:3 * H])   # candidate (x only)
    w = w.at[I:I + H, 3 * Hp:3 * Hp + H].set(wh[:, 2 * H:3 * H])   # candidate (h only)
    w = w.astype(bf16)

    b = jnp.zeros((1, 4 * Hp), f32)
    b = b.at[0, 0 * Hp:0 * Hp + H].set(bx[0 * H:1 * H] + bh[0 * H:1 * H])
    b = b.at[0, 1 * Hp:1 * Hp + H].set(bx[1 * H:2 * H] + bh[1 * H:2 * H])
    b = b.at[0, 2 * Hp:2 * Hp + H].set(bx[2 * H:3 * H])
    b = b.at[0, 3 * Hp:3 * Hp + H].set(bh[2 * H:3 * H])
    return w, b


# ----------------------------------------------------------------------------
# Wrapper
# ----------------------------------------------------------------------------
@functools.partial(jax.jit, static_argnames=("input_size", "hidden_size", "max_batch_tile"))
def gru_cell_packed(x, h_in, w_packed, b_packed, *, input_size, hidden_size,
                    max_batch_tile=128):
    B = x.shape[0]
    I, H = input_size, hidden_size
    Hp = _round_up(H, 128)
    Kp = _round_up(I + H, 128)
    TB = min(max_batch_tile, _round_up(B, 8))      # sublane-aligned batch tile
    Bp = _round_up(B, TB)

    f32, bf16 = jnp.float32, jnp.bfloat16

    # Concatenated + padded activations (bf16 for the MXU).
    xh = jnp.concatenate([x.astype(bf16), h_in.astype(bf16)], axis=1)
    xh = jnp.pad(xh, ((0, Bp - B), (0, Kp - (I + H))))
    # f32 copy of h for the final blend (keeps blend precision at full f32).
    h_pad = jnp.pad(h_in.astype(f32), ((0, Bp - B), (0, Hp - H)))

    out = pl.pallas_call(
        gru_cell_kernel,
        out_shape=jax.ShapeDtypeStruct((Bp, Hp), f32),
        grid=(Bp // TB,),
        in_specs=[
            pl.BlockSpec((TB, Kp), lambda i: (i, 0)),        # xh tile  (streamed)
            pl.BlockSpec((TB, Hp), lambda i: (i, 0)),        # h tile   (streamed)
            pl.BlockSpec((Kp, 4 * Hp), lambda i: (0, 0)),    # weight   (VMEM-resident)
            pl.BlockSpec((1, 4 * Hp), lambda i: (0, 0)),     # bias     (VMEM-resident)
        ],
        out_specs=pl.BlockSpec((TB, Hp), lambda i: (i, 0)),
        compiler_params=pltpu.CompilerParams(
            dimension_semantics=("parallel",),               # megacore shard on v7x
        ),
    )(xh, h_pad, w_packed, b_packed)

    return out[:B, :H].astype(x.dtype)


def gru_cell_pallas(x, h_in, wx, bx, wh, bh, *, max_batch_tile=128):
    """Convenience one-shot wrapper: pack + run."""
    I = x.shape[1]
    H = h_in.shape[1]
    w, b = pack_gru_params(wx, bx, wh, bh, I, H)
    return gru_cell_packed(x, h_in, w, b, input_size=I, hidden_size=H,
                           max_batch_tile=max_batch_tile)


# ----------------------------------------------------------------------------
# Pure-JAX f32 reference (mirrors the PyTorch module)
# ----------------------------------------------------------------------------
def gru_cell_reference(x, h_in, wx, bx, wh, bh):
    H = h_in.shape[1]
    ti = x @ wx + bx
    th = h_in @ wh + bh
    x_reset, x_upd, x_out = ti[:, :H], ti[:, H:2 * H], ti[:, 2 * H:]
    h_reset, h_upd, h_out = th[:, :H], th[:, H:2 * H], th[:, 2 * H:]
    reset_gate = jax.nn.sigmoid(x_reset + h_reset)
    update_gate = jax.nn.sigmoid(x_upd + h_upd)
    candidate = jnp.tanh(x_out + reset_gate * h_out)
    return update_gate * h_in + (1.0 - update_gate) * candidate


if __name__ == "__main__":
    batch = 2
    input_size = 16
    hidden_size = 32

    key = jax.random.PRNGKey(0)
    k_x, k_h, k_wx, k_bx, k_wh, k_bh = jax.random.split(key, 6)

    # Parameter init mirroring reset_parameters: U(-std, std), std = 1/sqrt(H)
    std = 1.0 / np.sqrt(hidden_size)
    wx = jax.random.uniform(k_wx, (input_size, 3 * hidden_size), jnp.float32, -std, std)
    bx = jax.random.uniform(k_bx, (3 * hidden_size,), jnp.float32, -std, std)
    wh = jax.random.uniform(k_wh, (hidden_size, 3 * hidden_size), jnp.float32, -std, std)
    bh = jax.random.uniform(k_bh, (3 * hidden_size,), jnp.float32, -std, std)

    x = jax.random.normal(k_x, (batch, input_size), jnp.float32)
    h_in = jax.random.normal(k_h, (batch, hidden_size), jnp.float32)

    h_out = gru_cell_pallas(x, h_in, wx, bx, wh, bh)
    h_out = jax.block_until_ready(h_out)

    h_ref = gru_cell_reference(x, h_in, wx, bx, wh, bh)
    # Tolerance loosened vs. pure-f32 because MXU operands are bf16
    # (accumulation stays f32, gate math and blend stay f32).
    np.testing.assert_allclose(np.asarray(h_out), np.asarray(h_ref), rtol=2e-2, atol=2e-2)

    print("KERNEL_OK")
</pallas_src>

<mosaic_0001>
module attributes {stable_mosaic.version = 11 : i64} {
  func.func @gru_cell_kernel(%arg0: i32, %arg1: memref<8x128xbf16, #tpu.memory_space<vmem>>, %arg2: memref<8x128xf32, #tpu.memory_space<vmem>>, %arg3: memref<128x512xbf16, #tpu.memory_space<vmem>>, %arg4: memref<1x512xf32, #tpu.memory_space<vmem>>, %arg5: memref<8x128xf32, #tpu.memory_space<vmem>>) attributes {dimension_semantics = [#tpu.dimension_semantics<parallel>], iteration_bounds = array<i64: 1>, scalar_prefetch = 0 : i64, scratch_operands = 0 : i64, tpu.core_type = #tpu.core_type<tc>, window_params = [{transform_indices = @transform_0, window_bounds = array<i64: 8, 128>}, {transform_indices = @transform_1, window_bounds = array<i64: 8, 128>}, {pipeline_mode = #tpu.pipeline_mode<synchronous>, transform_indices = @transform_2, window_bounds = array<i64: 128, 512>}, {pipeline_mode = #tpu.pipeline_mode<synchronous>, transform_indices = @transform_3, window_bounds = array<i64: 1, 512>}, {transform_indices = @transform_4, window_bounds = array<i64: 8, 128>}]} {
    %c0 = arith.constant 0 : index
    %c0_0 = arith.constant 0 : index
    %0 = vector.load %arg1[%c0, %c0_0] : memref<8x128xbf16, #tpu.memory_space<vmem>>, vector<8x128xbf16>
    %c0_1 = arith.constant 0 : index
    %c0_2 = arith.constant 0 : index
    %1 = vector.load %arg3[%c0_1, %c0_2] : memref<128x512xbf16, #tpu.memory_space<vmem>>, vector<128x512xbf16>
    %cst = arith.constant dense<0.000000e+00> : vector<8x512xf32>
    %2 = tpu.matmul %0, %1, %cst {dimension_numbers = #tpu.dot_dimension_numbers<[1], [0], [0], [1], [0, 0, 1, 1], [], []>} : vector<8x128xbf16>, vector<128x512xbf16>, vector<8x512xf32> -> vector<8x512xf32>
    %c0_3 = arith.constant 0 : index
    %c0_4 = arith.constant 0 : index
    %3 = vector.load %arg4[%c0_3, %c0_4] : memref<1x512xf32, #tpu.memory_space<vmem>>, vector<1x512xf32>
    %4 = vector.broadcast %3 : vector<1x512xf32> to vector<8x512xf32>
    %5 = arith.addf %2, %4 : vector<8x512xf32>
    %6 = vector.extract_strided_slice %5 {offsets = [0, 0], sizes = [8, 128], strides = [1, 1]} : vector<8x512xf32> to vector<8x128xf32>
    %7 = arith.negf %6 : vector<8x128xf32>
    %8 = math.exp %7 : vector<8x128xf32>
    %cst_5 = arith.constant 1.000000e+00 : f32
    %9 = vector.broadcast %cst_5 : f32 to vector<8x128xf32>
    %10 = arith.addf %9, %8 : vector<8x128xf32>
    %11 = arith.divf %9, %10 : vector<8x128xf32>
    %12 = vector.extract_strided_slice %5 {offsets = [0, 128], sizes = [8, 128], strides = [1, 1]} : vector<8x512xf32> to vector<8x128xf32>
    %13 = arith.negf %12 : vector<8x128xf32>
    %14 = math.exp %13 : vector<8x128xf32>
    %cst_6 = arith.constant 1.000000e+00 : f32
    %15 = vector.broadcast %cst_6 : f32 to vector<8x128xf32>
    %16 = arith.addf %15, %14 : vector<8x128xf32>
    %17 = arith.divf %15, %16 : vector<8x128xf32>
    %18 = vector.extract_strided_slice %5 {offsets = [0, 256], sizes = [8, 128], strides = [1, 1]} : vector<8x512xf32> to vector<8x128xf32>
    %19 = vector.extract_strided_slice %5 {offsets = [0, 384], sizes = [8, 128], strides = [1, 1]} : vector<8x512xf32> to vector<8x128xf32>
    %20 = arith.mulf %11, %19 : vector<8x128xf32>
    %21 = arith.addf %18, %20 : vector<8x128xf32>
    %22 = math.tanh %21 : vector<8x128xf32>
    %c0_7 = arith.constant 0 : index
    %c0_8 = arith.constant 0 : index
    %23 = vector.load %arg2[%c0_7, %c0_8] : memref<8x128xf32, #tpu.memory_space<vmem>>, vector<8x128xf32>
    %24 = arith.subf %23, %22 : vector<8x128xf32>
    %25 = arith.mulf %17, %24 : vector<8x128xf32>
    %26 = arith.addf %22, %25 : vector<8x128xf32>
    %c0_9 = arith.constant 0 : index
    %c0_10 = arith.constant 0 : index
    %27 = vector.load %arg5[%c0_9, %c0_10] : memref<8x128xf32, #tpu.memory_space<vmem>>, vector<8x128xf32>
    tpu.vector_store %arg5[%c0_9, %c0_10], %26 {strides = array<i32>} : memref<8x128xf32, #tpu.memory_space<vmem>>, vector<8x128xf32>,
    return
  }
  func.func @transform_0(%arg0: i32) -> (i32, i32) {
    %c0_i32 = arith.constant 0 : i32
    %c0_i32_0 = arith.constant 0 : i32
    return %arg0, %c0_i32 : i32, i32
  }
  func.func @transform_1(%arg0: i32) -> (i32, i32) {
    %c0_i32 = arith.constant 0 : i32
    %c0_i32_0 = arith.constant 0 : i32
    return %arg0, %c0_i32 : i32, i32
  }
  func.func @transform_2(%arg0: i32) -> (i32, i32) {
    %c0_i32 = arith.constant 0 : i32
    %c0_i32_0 = arith.constant 0 : i32
    %c0_i32_1 = arith.constant 0 : i32
    return %c0_i32, %c0_i32_0 : i32, i32
  }
  func.func @transform_3(%arg0: i32) -> (i32, i32) {
    %c0_i32 = arith.constant 0 : i32
    %c0_i32_0 = arith.constant 0 : i32
    %c0_i32_1 = arith.constant 0 : i32
    return %c0_i32, %c0_i32_0 : i32, i32
  }
  func.func @transform_4(%arg0: i32) -> (i32, i32) {
    %c0_i32 = arith.constant 0 : i32
    %c0_i32_0 = arith.constant 0 : i32
    return %arg0, %c0_i32 : i32, i32
  }
}

</mosaic_0001>

<bundles_post_ra>
// kernel: gru_cell_packed.1
= control target key start
LH: loop header
LB: loop body
LE: loop exit
PB: predicated region body
PF: predicated region fallthrough
CT: control target
= control target key end

     0   :  { %9 = vsyncpa [#allocation3], 0  ;;  %s474_s15 = smov [#allocation2]   ;;  %s527_s0 = inlined_call_operand.vmem [shape: bf16[8,128], index: 0, kind: input, shape index: {}]   ;;  %s528_s1 = inlined_call_operand.vmem [shape: f32[8,128], index: 1, kind: input, shape index: {}]   ;;  %s529_s2 = inlined_call_operand.hbm [shape: bf16[128,512], index: 2, kind: input, shape index: {}]   ;;  %s530_s3 = inlined_call_operand.vmem [shape: f32[1,512], index: 3, kind: input, shape index: {}]   ;;  %s531_s4 = inlined_call_operand.vmem [shape: f32[8,128], index: 4, kind: output, shape index: {}]  }
   0x1   :  { %s19_s16 = sshll.u32 %s474_s15, 4  ;;  %s450_s19 = scalar_lea.hbm %s529_s2, 4096  ;;  %s20_s16 = int_to_ptr.vmem [resolvable:$true] %s19_s16 }
   0x2   :  { %p451_p0 = scmp.ne.s32.totalorder %s529_s2, %s450_s19  ;;  %p454_p1 = scmp.lt.u32.totalorder %s450_s19, %s529_s2 }
   0x4   :  { %p456_p2 = pnand %p454_p1, %p451_p0 }
   0x6   :  { %459 = shalt.err (!%p456_p2)
}
   0x7   :  { %s460_s24 = scalar_lea.vmem %s20_s16, 4096  ;;  %p465_p4 = scmp.lt.s32.totalorder %s20_s16, %s20_s16 }
   0x8   :  { %p461_p3 = scmp.ne.s32.totalorder %s20_s16, %s460_s24  ;;  %p466_p5 = scmp.lt.s32.totalorder %s460_s24, %s460_s24 }
   0xa   :  { %p467_p6 = por %p466_p5, %p465_p4 }
   0xc   :  { %p468_p7 = pnand %p467_p6, %p461_p3 }
   0xe   :  { %471 = shalt.err (!%p468_p7)
}
   0xf   :  { %s475_s25 = smov 256   ;;  %s476_s26 = smov 16  }
  0x10   :  { %25 = dma.hbm_to_vmem [thread:$0]  %s529_s2, 4096, %s20_s16, [#allocation3], %s475_s25, %s475_s25, %s476_s26  }
  0x11   :  { %472 = dma.done.wait [#allocation3], 4096  }
  0x12   :  { %473 = vsyncadd [#allocation3], 4294963200  ;;  %v477_v0 = vmov 0   ;;  %v392_v1 = vld [vmem:[#allocation2 + $0x4] ss:$16 sps:$4 sm:$0xff]   ;;  %v67_v34 = vlaneseq }
  0x13   :  { %279 = vmatprep.mubr.bf16.mxu0 %v477_v0  ;;  %320 = vmatprep.mubr.bf16.mxu1 %v477_v0  ;;  %v394_v2 = vld [vmem:[#allocation2] ss:$16 sps:$4 sm:$0xff]   ;;  %v395_v3 = vld [vmem:[#allocation2 + $0x24] ss:$16 sps:$4 sm:$0xff]   ;;  %v410_v8 = vld [vmem:[#allocation2 + $0xc] ss:$16 sps:$4 sm:$0xff]  }
  0x14   :  { %247 = vmatprep.subr.bf16.mxu0 %v392_v1  ;;  %v397_v4 = vld [vmem:[#allocation2 + $0x20] ss:$16 sps:$4 sm:$0xff]   ;;  %v398_v5 = vld [vmem:[#allocation2 + $0x44] ss:$16 sps:$4 sm:$0xff]   ;;  %v412_v9 = vld [vmem:[#allocation2 + $0x8] ss:$16 sps:$4 sm:$0xff]   ;;  %288 = vmatprep.subr.bf16.mxu1 %v410_v8 }
  0x15   :  { %248 = vmatpush1.bf16.msra.mxu0 %v394_v2  ;;  %v400_v6 = vld [vmem:[#allocation2 + $0x40] ss:$16 sps:$4 sm:$0xff]   ;;  %v401_v7 = vld [vmem:[#allocation2 + $0x64] ss:$16 sps:$4 sm:$0xff]   ;;  %289 = vmatpush1.bf16.msra.mxu1 %v412_v9  ;;  %v416_v11 = vld [vmem:[#allocation2 + $0x2c] ss:$16 sps:$4 sm:$0xff]  }
  0x16   :  { %249 = vmatprep.subr.bf16.mxu0 %v395_v3  ;;  %v403_v10 = vld [vmem:[#allocation2 + $0x60] ss:$16 sps:$4 sm:$0xff]   ;;  %v418_v12 = vld [vmem:[#allocation2 + $0x28] ss:$16 sps:$4 sm:$0xff]   ;;  %v404_v13 = vld [vmem:[#allocation2 + $0x84] ss:$16 sps:$4 sm:$0xff]   ;;  %290 = vmatprep.subr.bf16.mxu1 %v416_v11 }
  0x17   :  { %v406_v14 = vld [vmem:[#allocation2 + $0x80] ss:$16 sps:$4 sm:$0xff]   ;;  %v407_v15 = vld [vmem:[#allocation2 + $0xa4] ss:$16 sps:$4 sm:$0xff]   ;;  %v422_v16 = vld [vmem:[#allocation2 + $0x4c] ss:$16 sps:$4 sm:$0xff]  }
  0x18   :  { %v424_v17 = vld [vmem:[#allocation2 + $0x48] ss:$16 sps:$4 sm:$0xff]   ;;  %v425_v18 = vld [vmem:[#allocation2 + $0x6c] ss:$16 sps:$4 sm:$0xff]   ;;  %v409_v19 = vld [vmem:[#allocation2 + $0xa0] ss:$16 sps:$4 sm:$0xff]  }
  0x19   :  { %250 = vmatpush1.bf16.msra.mxu0 %v397_v4  ;;  %291 = vmatpush1.bf16.msra.mxu1 %v418_v12  ;;  %v413_v20 = vld [vmem:[#allocation2 + $0xc4] ss:$16 sps:$4 sm:$0xff]   ;;  %v427_v21 = vld [vmem:[#allocation2 + $0x68] ss:$16 sps:$4 sm:$0xff]   ;;  %v428_v22 = vld [vmem:[#allocation2 + $0x8c] ss:$16 sps:$4 sm:$0xff]  }
  0x1a   :  { %251 = vmatprep.subr.bf16.mxu0 %v398_v5  ;;  %292 = vmatprep.subr.bf16.mxu1 %v422_v16  ;;  %v415_v23 = vld [vmem:[#allocation2 + $0xc0] ss:$16 sps:$4 sm:$0xff]   ;;  %v430_v24 = vld [vmem:[#allocation2 + $0x88] ss:$16 sps:$4 sm:$0xff]   ;;  %v419_v25 = vld [vmem:[#allocation2 + $0xe4] ss:$16 sps:$4 sm:$0xff]  }
  0x1b   :  { %v431_v26 = vld [vmem:[#allocation2 + $0xac] ss:$16 sps:$4 sm:$0xff]   ;;  %v421_v27 = vld [vmem:[#allocation2 + $0xe0] ss:$16 sps:$4 sm:$0xff]   ;;  %v433_v28 = vld [vmem:[#allocation2 + $0xa8] ss:$16 sps:$4 sm:$0xff]  }
  0x1c   :  { %v434_v29 = vld [vmem:[#allocation2 + $0xcc] ss:$16 sps:$4 sm:$0xff]   ;;  %v32_v30 = vld [vmem:[%s527_s0] sm:$0xf]  ;;  %v436_v31 = vld [vmem:[#allocation2 + $0xc8] ss:$16 sps:$4 sm:$0xff]  }
  0x1d   :  { %252 = vmatpush1.bf16.msra.mxu0 %v400_v6  ;;  %293 = vmatpush1.bf16.msra.mxu1 %v424_v17  ;;  %v437_v32 = vld [vmem:[#allocation2 + $0xec] ss:$16 sps:$4 sm:$0xff]   ;;  %v439_v33 = vld [vmem:[#allocation2 + $0xe8] ss:$16 sps:$4 sm:$0xff]   ;;  %v68_v35 = vshrl.u32 %v67_v34, 7  ;;  %v344_v2 = vld [vmem:[%s528_s1] sm:$0xff] }
  0x1e   :  { %253 = vmatprep.subr.bf16.mxu0 %v401_v7  ;;  %294 = vmatprep.subr.bf16.mxu1 %v425_v18  ;;  %v65_v37 = vld [vmem:[%s530_s3] sm:$0xf] }
  0x1f   :  { %v69_v36 = vsub.s32 0, %v68_v35  ;;  %v73_v41 = vsub.s32 1, %v68_v35  ;;  %v81_v55 = vsub.s32 3, %v68_v35  ;;  %v77_v56 = vsub.s32 2, %v68_v35 }
  0x21   :  { %254 = vmatpush1.bf16.msra.mxu0 %v403_v10  ;;  %295 = vmatpush1.bf16.msra.mxu1 %v427_v21  ;;  %v70_v38 = vrot.slane %v65_v37, %v69_v36  ;;  %v74_v46 = vrot.slane %v65_v37, %v73_v41  ;;  %v82_v57 = vrot.slane %v65_v37, %v81_v55 }
  0x22   :  { %255 = vmatprep.subr.bf16.mxu0 %v404_v13  ;;  %296 = vmatprep.subr.bf16.mxu1 %v428_v22  ;;  %v78_v58 = vrot.slane %v65_v37, %v77_v56 }
  0x25   :  { %256 = vmatpush1.bf16.msra.mxu0 %v406_v14  ;;  %297 = vmatpush1.bf16.msra.mxu1 %v430_v24 }
  0x26   :  { %257 = vmatprep.subr.bf16.mxu0 %v407_v15  ;;  %298 = vmatprep.subr.bf16.mxu1 %v431_v26 }
  0x29   :  { %258 = vmatpush1.bf16.msra.mxu0 %v409_v19  ;;  %299 = vmatpush1.bf16.msra.mxu1 %v433_v28 }
  0x2a   :  { %259 = vmatprep.subr.bf16.mxu0 %v413_v20  ;;  %300 = vmatprep.subr.bf16.mxu1 %v434_v29 }
  0x2d   :  { %260 = vmatpush1.bf16.msra.mxu0 %v415_v23  ;;  %301 = vmatpush1.bf16.msra.mxu1 %v436_v31 }
  0x2e   :  { %261 = vmatprep.subr.bf16.mxu0 %v419_v25  ;;  %302 = vmatprep.subr.bf16.mxu1 %v437_v32 }
  0x31   :  { %262 = vmatpush1.bf16.msra.mxu0 %v421_v27  ;;  %303 = vmatpush1.bf16.msra.mxu1 %v439_v33 }
  0x34   :  { %280 = vmatmul.mubr.bf16.vlgmr.msra.gmra.mrb[0].mxu0 %v32_v30  ;;  %321 = vmatmul.mubr.bf16.vlgmr.msra.gmra.mrb[0].mxu1 %v32_v30 }
 0x107   :  { %v281_v39 = vpop.f32.mrb[0].mxu0  ;;  %v322_v47 = vpop.f32.mrb[0].mxu1 }
 0x108   :  { %v282_v40 = vadd.f32 %v281_v39, %v70_v38  ;;  %v283_v42 = vpop.f32.mrb[1].mxu0  ;;  %v324_v49 = vpop.f32.mrb[1].mxu1  ;;  %v323_v62 = vadd.f32 %v322_v47, %v78_v58 }
 0x109   :  { %v285_v43 = vpop.f32.mrb[2].mxu0  ;;  %v284_v48 = vadd.f32 %v283_v42, %v74_v46  ;;  %v326_v50 = vpop.f32.mrb[2].mxu1  ;;  %v325_v59 = vadd.f32 %v324_v49, %v82_v57 }
 0x10a   :  { %v386_v44 = vmul.f32 -1.442695, %v282_v40  ;;  %v286_v45 = vpop.f32.mrb[3].mxu0  ;;  %v327_v51 = vpop.f32.mrb[3].mxu1 }
 0x10b   :  { %v387_v52 = vmul.f32 -1.442695, %v284_v48 }
 0x10c   :  { %440 = vpow2.f32 %v386_v44 }
 0x10d   :  { %442 = vpow2.f32 %v387_v52 }
 0x116   :  { %v441_v53 = vpop.eup %440 }
 0x117   :  { %v332_v54 = vadd.f32 1.0, %v441_v53  ;;  %v443_v60 = vpop.eup %442 }
 0x118   :  { %v338_v0 = vadd.f32 1.0, %v443_v60 }
 0x119   :  { %444 = vrcp.f32 %v332_v54 }
 0x123   :  { %v445_v61 = vpop.eup %444 }
 0x124   :  { %v341_v63 = vmul.f32 %v445_v61, %v325_v59 }
 0x126   :  { %v342_v1 = vadd.f32 %v341_v63, %v323_v62 }
 0x128   :  { %446 = vtanh.f32 %v342_v1 }
 0x129   :  { %448 = vrcp.f32 %v338_v0 }
 0x132   :  { %v447_v3 = vpop.eup %446 }
 0x133   :  { %v345_v4 = vsub.f32 %v344_v2, %v447_v3  ;;  %v449_v5 = vpop.eup %448 }
 0x135   :  { %v346_v6 = vmul.f32 %v449_v5, %v345_v4 }
 0x137   :  { %v347_v7 = vadd.f32 %v447_v3, %v346_v6 }
 0x139   :  { %348 = vst [vmem:[%s531_s4] sm:$0xff] %v347_v7 }
 0x13a   :  { %353 = vsyncpa [#allocation3], 1 }

</bundles_post_ra>
